<compile_context>
chip_gen: v6e
topology: v6e:2x2x1
jax: 0.10.0
libtpu: 0.0.40
codegen_flags: <defaults>
</compile_context>

<pallas_src>
from functools import partial

import jax
import jax.numpy as jnp
from jax.experimental import pallas as pl
from jax.experimental.pallas import tpu as pltpu

_BLOCK_BYTES = 4 * 1024 * 1024       # per-buffer DMA target (~4 MiB)
_VMEM_LIMIT = 32 * 1024 * 1024       # 4 buffers x 4 MiB + slack; <= physical VMEM on v5e/v6e/v7x


# ------------------------- Pallas kernel (backward) -------------------------

def _neg_scale_kernel(neg_coeff_ref, g_ref, o_ref):
    """grad_in = (-coeff) * grad_out for one (tr, lane) tile."""
    nc = neg_coeff_ref[0]                                  # f32 scalar from SMEM
    o_ref[...] = (g_ref[...] * nc).astype(o_ref.dtype)    # multiply in f32, cast once


# ------------------------- layout helpers (all copy-free) -------------------------

def _sublane_multiple(dtype):
    """Packed rows per vreg sublane group: 8 for 4-byte, 16 for 2-byte, 32 for 1-byte."""
    itemsize = jnp.dtype(dtype).itemsize
    if itemsize >= 4:
        return 8
    return (4 // itemsize) * 8


def _slab_view(g, sub):
    """Metadata-only 2-D view of g (no pad, no slice, no data movement)."""
    n = g.size
    if g.ndim == 0:
        return jnp.reshape(g, (1, 1))
    if n % 128 == 0:
        lanes = [l for l in (2048, 1024, 512, 256, 128) if n % l == 0]
        # Prefer a lane width that also makes the row count sublane-aligned.
        for lane in lanes:
            if (n // lane) % sub == 0:
                return jnp.reshape(g, (n // lane, lane))
        lane = lanes[-1]
        return jnp.reshape(g, (n // lane, lane))
    # Ragged total size: collapse leading dims (free); the native trailing dim
    # stays the lane axis and Pallas masks the partial edge (no extra HBM pass).
    # TODO(synk): also tile the lane axis for enormous ragged 1-D gradients.
    return jnp.reshape(g, (n // g.shape[-1], g.shape[-1]))


def _row_tile(rows, lane, dtype):
    """Row-block size: byte-budgeted, dtype-aware sublane-aligned, >=2 grid steps if possible."""
    sub = _sublane_multiple(dtype)
    itemsize = jnp.dtype(dtype).itemsize
    budget = max(sub, (_BLOCK_BYTES // max(1, lane * itemsize)) // sub * sub)
    if rows >= 2 * sub:
        # Keep at least 2 grid steps so the "parallel" axis can shard across
        # v7x's two TensorCores.
        budget = min(budget, max(sub, ((rows + 1) // 2) // sub * sub))
    # If the budget covers everything, use a single full-extent block (a block
    # dim equal to the full array dim is always legal, even if not a multiple
    # of the native tile).
    return rows if budget >= rows else budget


# ------------------------- backward wrapper -------------------------

def _neg_scale_pallas(g, coeff):
    """-coeff * g as one tiled, pipelined, memory-bound Pallas launch."""
    if g.size == 0:
        return g
    sub = _sublane_multiple(g.dtype)
    slab = _slab_view(g, sub)
    rows, lane = slab.shape
    tr = _row_tile(rows, lane, g.dtype)
    neg_coeff = jnp.full((1,), -float(coeff), dtype=jnp.float32)

    out = pl.pallas_call(
        _neg_scale_kernel,
        out_shape=jax.ShapeDtypeStruct((rows, lane), slab.dtype),
        grid=(pl.cdiv(rows, tr),),
        in_specs=[
            pl.BlockSpec(memory_space=pltpu.MemorySpace.SMEM),   # (1,) -coeff scalar
            pl.BlockSpec((tr, lane), lambda i: (i, 0)),          # grad tile
        ],
        out_specs=pl.BlockSpec((tr, lane), lambda i: (i, 0)),
        input_output_aliases={1: 0},                             # in-place when g is donated
        compiler_params=pltpu.CompilerParams(
            dimension_semantics=("parallel",),
            vmem_limit_bytes=_VMEM_LIMIT,
        ),
    )(neg_coeff, slab)
    return jnp.reshape(out, g.shape)


# ------------------------- GRL with custom VJP -------------------------

@partial(jax.custom_vjp, nondiff_argnums=(1,))
def gradient_reverse(x, coeff=1.0):
    # Forward is an exact identity: no kernel, no extra HBM traffic.
    return x


def _grl_fwd(x, coeff):
    return x, None


def _grl_bwd(coeff, _res, g):
    # Only a cotangent for x; coeff is a static (non-differentiable) argument.
    return (_neg_scale_pallas(g, coeff),)


gradient_reverse.defvjp(_grl_fwd, _grl_bwd)


class GradientReverseLayer:
    """JAX/Pallas equivalent of the PyTorch GradientReverseLayer module."""

    def __call__(self, *inputs):
        return gradient_reverse(*inputs)


# ------------------------- demo -------------------------

if __name__ == "__main__":
    key = jax.random.PRNGKey(0)
    x = jax.random.normal(key, (2, 4, 16, 16), dtype=jnp.float32)  # NCHW
    coeff = 0.5

    grl = GradientReverseLayer()

    # Forward: exact identity, same shape/dtype (no kernel launch).
    y = jax.block_until_ready(grl(x, coeff))
    assert y.shape == x.shape and y.dtype == x.dtype
    assert jnp.allclose(y, x), "forward must be identity"

    # Backward (runs the Pallas kernel): grad of sum(GRL(x)) is -coeff.
    gfn = jax.grad(lambda xx: jnp.sum(gradient_reverse(xx, coeff)))
    gx = jax.block_until_ready(gfn(x))
    assert jnp.allclose(gx, jnp.full_like(x, -coeff)), "backward must reverse gradients"

    # Same result under jit.
    gx_jit = jax.block_until_ready(jax.jit(gfn)(x))
    assert jnp.allclose(gx_jit, jnp.full_like(x, -coeff)), "jit backward mismatch"

    # bf16 gradients exercise the dtype-aware (16-row sublane) tiling path.
    xb = x.astype(jnp.bfloat16)
    gfn_b = jax.grad(
        lambda xx: jnp.sum(gradient_reverse(xx, coeff).astype(jnp.float32)))
    gb = jax.block_until_ready(gfn_b(xb))
    assert gb.dtype == jnp.bfloat16
    assert jnp.allclose(gb.astype(jnp.float32), jnp.full(x.shape, -coeff)), \
        "bf16 backward must reverse gradients"

    print("KERNEL_OK")
</pallas_src>

<mosaic_0001>
module attributes {stable_mosaic.version = 11 : i64} {
  func.func @_neg_scale_kernel(%arg0: i32, %arg1: memref<1xf32, #tpu.memory_space<smem>>, %arg2: memref<8x256xf32, #tpu.memory_space<vmem>>, %arg3: memref<8x256xf32, #tpu.memory_space<vmem>>) attributes {dimension_semantics = [#tpu.dimension_semantics<parallel>], iteration_bounds = array<i64: 1>, scalar_prefetch = 0 : i64, scratch_operands = 0 : i64, tpu.core_type = #tpu.core_type<tc>, window_params = [{transform_indices = @transform_0, window_bounds = array<i64: 1>}, {transform_indices = @transform_1, window_bounds = array<i64: 8, 256>}, {transform_indices = @transform_2, window_bounds = array<i64: 8, 256>}]} {
    %c0 = arith.constant 0 : index
    %0 = memref.load %arg1[%c0] : memref<1xf32, #tpu.memory_space<smem>>
    %c0_0 = arith.constant 0 : index
    %c0_1 = arith.constant 0 : index
    %1 = vector.load %arg2[%c0_0, %c0_1] : memref<8x256xf32, #tpu.memory_space<vmem>>, vector<8x256xf32>
    %2 = vector.broadcast %0 : f32 to vector<8x256xf32>
    %3 = arith.mulf %1, %2 : vector<8x256xf32>
    %c0_2 = arith.constant 0 : index
    %c0_3 = arith.constant 0 : index
    %4 = vector.load %arg3[%c0_2, %c0_3] : memref<8x256xf32, #tpu.memory_space<vmem>>, vector<8x256xf32>
    tpu.vector_store %arg3[%c0_2, %c0_3], %3 {strides = array<i32>} : memref<8x256xf32, #tpu.memory_space<vmem>>, vector<8x256xf32>,
    return
  }
  func.func @transform_0(%arg0: i32) -> i32 {
    %c0_i32 = arith.constant 0 : i32
    %c0_i32_0 = arith.constant 0 : i32
    return %c0_i32 : i32
  }
  func.func @transform_1(%arg0: i32) -> (i32, i32) {
    %c0_i32 = arith.constant 0 : i32
    %c0_i32_0 = arith.constant 0 : i32
    return %arg0, %c0_i32 : i32, i32
  }
  func.func @transform_2(%arg0: i32) -> (i32, i32) {
    %c0_i32 = arith.constant 0 : i32
    %c0_i32_0 = arith.constant 0 : i32
    return %arg0, %c0_i32 : i32, i32
  }
}

</mosaic_0001>

<bundles_post_ra>
// kernel: tpu_custom_call.1
= control target key start
LH: loop header
LB: loop body
LE: loop exit
PB: predicated region body
PF: predicated region fallthrough
CT: control target
= control target key end

     0   :  { %8 = vsyncpa [#allocation4], 0  ;;  %s120_s0 = inlined_call_operand.<no memory space> [shape: f32[1], index: 0, kind: input, shape index: {}]   ;;  %s121_s1 = inlined_call_operand.hbm [shape: f32[8,256], index: 1, kind: input, shape index: {}, may-alias: {1,2}]   ;;  %s122_s2 = inlined_call_operand.hbm [shape: f32[8,256], index: 2, kind: output, shape index: {}, may-alias: {1,2}]  }
   0x1   :  { %9 = vsyncpa [#allocation5], 0  ;;  %s94_s9 = smov [#allocation3]  }
   0x2   :  { %s18_s10 = sshll.u32 %s94_s9, 4  ;;  %s19_s10 = int_to_ptr.vmem [resolvable:$true] %s18_s10 }
   0x3   :  { %s58_s11 = scalar_lea.vmem %s19_s10, 256  ;;  %p63_p1 = scmp.lt.s32.totalorder %s19_s10, %s19_s10 }
   0x4   :  { %p59_p0 = scmp.ne.s32.totalorder %s19_s10, %s58_s11  ;;  %p64_p2 = scmp.lt.s32.totalorder %s58_s11, %s58_s11 }
   0x6   :  { %p65_p3 = por %p64_p2, %p63_p1 }
   0x8   :  { %p66_p4 = pnand %p65_p3, %p59_p0 }
   0xa   :  { %69 = shalt.err (!%p66_p4)
}
   0xb   :  { %21 = dma.hbm_to_vmem [thread:$0]  %s121_s1, 256, %s19_s10, [#allocation4]  }
   0xc   :  { %90 = dma.done.wait [#allocation4], 256  }
   0xd   :  { %91 = vsyncadd [#allocation4], 4294967040  ;;  %v28_v0 = vstv %s120_s0  ;;  %s95_s16 = smov [#allocation6]   ;;  %v26_v1 = vld [vmem:[#allocation3] sm:$0xff]  ;;  %v27_v2 = vld [vmem:[#allocation3 + $0x8] sm:$0xff] }
   0xe   :  { %s39_s17 = sshll.u32 %s95_s16, 4  ;;  %v29_v3 = vmul.f32 %v28_v0, %v26_v1  ;;  %v30_v4 = vmul.f32 %v28_v0, %v27_v2  ;;  %s40_s17 = int_to_ptr.vmem [resolvable:$true] %s39_s17 }
   0xf   :  { %s70_s18 = scalar_lea.vmem %s40_s17, 256  ;;  %p75_p6 = scmp.lt.s32.totalorder %s40_s17, %s40_s17 }
  0x10   :  { %31 = vst [vmem:[#allocation6] sm:$0xff] %v29_v3  ;;  %32 = vst [vmem:[#allocation6 + $0x8] sm:$0xff] %v30_v4  ;;  %p71_p5 = scmp.ne.s32.totalorder %s40_s17, %s70_s18  ;;  %p76_p7 = scmp.lt.s32.totalorder %s70_s18, %s70_s18 }
  0x12   :  { %p77_p8 = por %p76_p7, %p75_p6 }
  0x14   :  { %p78_p9 = pnand %p77_p8, %p71_p5 }
  0x16   :  { %81 = shalt.err (!%p78_p9)
}
  0x17   :  { %42 = dma.vmem_to_hbm [thread:$0]  %s40_s17, 256, %s122_s2, [#allocation5]  }
  0x18   :  { %92 = dma.done.wait [#allocation5], 256  }
  0x19   :  { %93 = vsyncadd [#allocation5], 4294967040 }
  0x1a   :  { %46 = vsyncpa [#allocation4], 1 }
  0x1b   :  { %47 = vsyncpa [#allocation5], 1 }

</bundles_post_ra>
